<compile_context>
chip_gen: v7x
topology: tpu7x:2x2x1
jax: 0.10.0
libtpu: 0.0.40
codegen_flags: <defaults>
</compile_context>

<pallas_src>
import numpy as np
import jax
import jax.numpy as jnp
from jax.experimental import pallas as pl
from jax.experimental.pallas import tpu as pltpu

LANE = 128


def _round_up(n, m):
    return ((n + m - 1) // m) * m


def _make_kernel(nlayers, hg):
    L, Hg = nlayers, hg

    def kernel(x_ref,                     # (Tp, Kx)      f32  packed trigger
               nz_ref,                    # (Tp, Kx)      f32  packed noise
               w0_ref,                    # (Kx, 3Hg)     f32  enc folded into layer-0 ih
               w_ih_ref,                  # (L-1, Hg, 3Hg) bf16 block-diag gate weights
               b_g_ref,                   # (L, 1, 3Hg)   f32  folded gate biases
               b_hn_ref,                  # (L, 1, Hg)    f32  b_hh of the n gate
               dec_w_ref,                 # (Hg, pack)    f32  block-diag decoder
               dec_b_ref,                 # (1, 1)        f32
               y_ref,                     # (Tp, pack)    f32
               h_out_ref=None):           # (L, Tp, Hg)   f32  (optional output)
        # multiplicative N(1, 0.5) noise applied to the packed trigger.
        xn = x_ref[...] * nz_ref[...]                                # (Tp, Kx)

        # layer 0: encoder Linear(1->H) is folded into the ih projection, so
        # the gate pre-activation is one small-K MXU matmul. Each 128-lane row
        # of g holds `pack` batch rows x H hidden per gate slot.
        g = (jnp.dot(xn, w0_ref[...], preferred_element_type=jnp.float32)
             + b_g_ref[0])                                           # (Tp, 3Hg)

        h = None
        for l in range(L):                                           # tiny static unroll
            if l > 0:
                # h0 == 0 => recurrent matmul removed (gh == b_hh, bit-exact);
                # only the input projection of the previous layer's output runs.
                g = (jnp.dot(h.astype(jnp.bfloat16), w_ih_ref[l - 1],
                             preferred_element_type=jnp.float32)
                     + b_g_ref[l])
            r = jax.nn.sigmoid(g[:, 0:Hg])
            z = jax.nn.sigmoid(g[:, Hg:2 * Hg])
            n = jnp.tanh(g[:, 2 * Hg:3 * Hg] + r * b_hn_ref[l])
            h = (1.0 - z) * n                                        # dropout p=0 -> identity
            if h_out_ref is not None:
                h_out_ref[l] = h                                     # lane-dense, packed

        # decoder Linear(H->1) as a block-diagonal MXU matmul: column j of the
        # result is the decoded value of packed batch row j.
        y_ref[...] = (jnp.dot(h, dec_w_ref[...],
                              preferred_element_type=jnp.float32)
                      + dec_b_ref[...])

    return kernel


def init_params(key, nhid=32, nlayers=2, input_features=1):
    """Deterministic parameter init mirroring RNNSynthesizer.init_weights()."""
    H, L, F = nhid, nlayers, input_features
    assert F == 1, "RNNSynthesizer uses scalar triggers"
    keys = jax.random.split(key, 2 + 3 * L)

    # encoder / decoder: uniform(-0.1, 0.1) weights, zero bias (stored transposed)
    enc_w = jax.random.uniform(keys[0], (F, H), jnp.float32, -0.1, 0.1)
    enc_b = jnp.zeros((1, H), jnp.float32)
    dec_w = jax.random.uniform(keys[1], (H, F), jnp.float32, -0.1, 0.1)
    dec_b = jnp.zeros((1, F), jnp.float32)

    # GRU layers: orthogonal weight_ih, default-uniform biases (gate order r,z,n).
    # weight_hh is mathematically dead (h0 == 0 every call) -> not generated.
    bound = 1.0 / (H ** 0.5)
    w_ih, b_ih, b_hh = [], [], []
    for l in range(L):
        k0, k1, k2 = keys[2 + 3 * l: 5 + 3 * l]
        q_ih, _ = jnp.linalg.qr(jax.random.normal(k0, (3 * H, H), jnp.float32))
        w_ih.append(q_ih.T)                                          # (H, 3H) = weight_ih.T
        b_ih.append(jax.random.uniform(k1, (1, 3 * H), jnp.float32, -bound, bound))
        b_hh.append(jax.random.uniform(k2, (1, 3 * H), jnp.float32, -bound, bound))

    return dict(enc_w=enc_w, enc_b=enc_b, dec_w=dec_w, dec_b=dec_b,
                w_ih=jnp.stack(w_ih), b_ih=jnp.stack(b_ih), b_hh=jnp.stack(b_hh),
                nhid=H, nlayers=L)


def prepare_kernel_params(p):
    """Host-side packing: fold encoder into layer 0, fold b_ih+b_hh (zero h0),
    pack `pack = 128 // H` batch rows per 128-lane row with block-diagonal gate
    and decoder weights, cast the large gate weights to bf16."""
    H, L = p["nhid"], p["nlayers"]
    if H <= LANE and LANE % H == 0:
        pack = LANE // H                     # batch rows per 128-lane row
    else:
        pack = 1                             # fallback: pad H up to 128 lanes
    Hg = _round_up(pack * H, LANE)           # lanes per gate slot
    Kx = _round_up(pack, 8)                  # K of the layer-0 matmul (f32 sublane tile)

    enc_w = np.asarray(p["enc_w"], dtype=np.float32)      # (1, H)
    enc_b = np.asarray(p["enc_b"], dtype=np.float32)      # (1, H)
    dec_w = np.asarray(p["dec_w"], dtype=np.float32)      # (H, 1)
    dec_b = np.asarray(p["dec_b"], dtype=np.float32).reshape(1, 1)
    w_ih = np.asarray(p["w_ih"], dtype=np.float32)        # (L, H, 3H)
    b_ih = np.asarray(p["b_ih"], dtype=np.float32)        # (L, 1, 3H)
    b_hh = np.asarray(p["b_hh"], dtype=np.float32)        # (L, 1, 3H)

    # encoder folded into layer 0 (both linear): row0 scales x, const0 is bias.
    row0 = enc_w @ w_ih[0]                                 # (1, 3H)
    const0 = enc_b @ w_ih[0]                               # (1, 3H)

    def tile_gates(v3h):                                   # (3H,) -> (3*Hg,)
        out = np.zeros((3 * Hg,), np.float32)
        for g in range(3):
            for j in range(pack):
                out[g * Hg + j * H: g * Hg + (j + 1) * H] = v3h[g * H:(g + 1) * H]
        return out

    def tile_hidden(vh):                                   # (H,) -> (Hg,)
        out = np.zeros((Hg,), np.float32)
        for j in range(pack):
            out[j * H:(j + 1) * H] = vh
        return out

    # folded gate biases: b_ih + b_hh for r/z (gh == b_hh), b_ih for n;
    # layer 0 additionally absorbs enc_b @ W_ih0.
    b_g = np.zeros((L, 1, 3 * Hg), np.float32)
    b_hn = np.zeros((L, 1, Hg), np.float32)
    for l in range(L):
        real = np.zeros((3 * H,), np.float32)
        real[0:2 * H] = b_ih[l, 0, 0:2 * H] + b_hh[l, 0, 0:2 * H]
        real[2 * H:3 * H] = b_ih[l, 0, 2 * H:3 * H]
        if l == 0:
            real += const0[0]
        b_g[l, 0] = tile_gates(real)
        b_hn[l, 0] = tile_hidden(b_hh[l, 0, 2 * H:3 * H])

    # layer 0 input projection with the encoder folded in: row j feeds packed
    # batch row j (block structure of the batch-per-lane-row packing).
    w0 = np.zeros((Kx, 3 * Hg), np.float32)
    for g in range(3):
        for j in range(pack):
            w0[j, g * Hg + j * H: g * Hg + (j + 1) * H] = row0[0, g * H:(g + 1) * H]

    # layers 1..L-1: per-gate block-diagonal (pack copies) weights for the MXU.
    Lm1 = max(L - 1, 1)
    w_ih_p = np.zeros((Lm1, Hg, 3 * Hg), np.float32)
    for l in range(1, L):
        for g in range(3):
            for j in range(pack):
                w_ih_p[l - 1, j * H:(j + 1) * H,
                       g * Hg + j * H: g * Hg + (j + 1) * H] = \
                    w_ih[l][:, g * H:(g + 1) * H]

    # decoder as a block-diagonal (Hg, pack) MXU matmul (no transpose+reduce).
    dec_blk = np.zeros((Hg, pack), np.float32)
    for j in range(pack):
        dec_blk[j * H:(j + 1) * H, j] = dec_w[:, 0]

    return dict(w0=jnp.asarray(w0),
                w_ih=jnp.asarray(w_ih_p).astype(jnp.bfloat16),
                b_g=jnp.asarray(b_g), b_hn=jnp.asarray(b_hn),
                dec_w=jnp.asarray(dec_blk), dec_b=jnp.asarray(dec_b),
                nhid=H, nlayers=L, pack=pack, hg=Hg, kx=Kx)


def rnn_synthesizer_forward(trigger, kparams, noise_key=None, return_hidden=True):
    """Returns (result with trigger.shape, new hidden states (L, B, H) or None)."""
    H, L = kparams["nhid"], kparams["nlayers"]
    pack, Hg, Kx = kparams["pack"], kparams["hg"], kparams["kx"]
    B = int(trigger.size)

    # Batch tiling: lane-multiple tiles, capped at 2048. For B > 128 aim for
    # >=2 grid steps so "parallel" can shard tiles over v7x's two TensorCores.
    b128 = _round_up(max(B, 1), LANE)
    if b128 <= LANE:
        tile_b = LANE
    else:
        tile_b = min(2048, _round_up((b128 + 1) // 2, LANE))
    b_pad = _round_up(b128, tile_b)
    grid = (b_pad // tile_b,)
    rows = b_pad // pack                 # packed rows (pack batch elems / row)
    tile_rows = tile_b // pack

    x_flat = jnp.zeros((b_pad,), jnp.float32).at[:B].set(
        jnp.ravel(trigger).astype(jnp.float32))
    xp = jnp.zeros((rows, Kx), jnp.float32).at[:, :pack].set(
        x_flat.reshape(rows, pack))

    # multiplicative N(1, 0.5) noise, drawn host-side with jax.random so the
    # realized noise is reproducible and independent of the tiling/grid.
    if noise_key is None:
        noise_key = jax.random.PRNGKey(0)
    nz = jnp.zeros((rows, Kx), jnp.float32).at[:, :pack].set(
        1.0 + 0.5 * jax.random.normal(noise_key, (rows, pack), jnp.float32))

    Lm1 = max(L - 1, 1)
    kernel = _make_kernel(L, Hg)

    out_shape = [jax.ShapeDtypeStruct((rows, pack), jnp.float32)]
    out_specs = [pl.BlockSpec((tile_rows, pack), lambda i: (i, 0))]
    if return_hidden:
        out_shape.append(jax.ShapeDtypeStruct((L, rows, Hg), jnp.float32))
        out_specs.append(pl.BlockSpec((L, tile_rows, Hg), lambda i: (0, i, 0)))

    outs = pl.pallas_call(
        kernel,
        out_shape=tuple(out_shape),
        grid_spec=pltpu.PrefetchScalarGridSpec(
            num_scalar_prefetch=0,
            grid=grid,
            in_specs=[
                pl.BlockSpec((tile_rows, Kx), lambda i: (i, 0)),        # packed trigger
                pl.BlockSpec((tile_rows, Kx), lambda i: (i, 0)),        # packed noise
                pl.BlockSpec((Kx, 3 * Hg), lambda i: (0, 0)),           # layer-0 (enc-folded) weights
                pl.BlockSpec((Lm1, Hg, 3 * Hg), lambda i: (0, 0, 0)),   # layer>=1 gate weights (bf16)
                pl.BlockSpec((L, 1, 3 * Hg), lambda i: (0, 0, 0)),      # folded gate biases
                pl.BlockSpec((L, 1, Hg), lambda i: (0, 0, 0)),          # b_hh of the n gate
                pl.BlockSpec((Hg, pack), lambda i: (0, 0)),             # block-diag decoder
                pl.BlockSpec((1, 1), lambda i: (0, 0)),                 # decoder bias
            ],
            out_specs=tuple(out_specs),
        ),
        compiler_params=pltpu.CompilerParams(
            dimension_semantics=("parallel",)),   # shard batch tiles over TCs
    )(xp, nz, kparams["w0"], kparams["w_ih"], kparams["b_g"], kparams["b_hn"],
      kparams["dec_w"], kparams["dec_b"])

    y_pad = outs[0].reshape(b_pad)
    result = y_pad[:B].reshape(trigger.shape)

    if not return_hidden:
        return result, None

    h_pad = outs[1]                                        # (L, rows, Hg)
    if pack * H == Hg:
        # free, bit-identical reshape: (L, b_pad/pack, pack*H) == (L, b_pad, H)
        h_new = h_pad.reshape(L, b_pad, H)[:, :B, :]
    else:
        h_new = h_pad[:, :B, :H]                           # pack == 1 fallback
    return result, h_new


if __name__ == "__main__":
    key = jax.random.PRNGKey(0)
    k_param, k_trig, k_noise = jax.random.split(key, 3)

    NHID, NLAYERS = 32, 2
    params = init_params(k_param, nhid=NHID, nlayers=NLAYERS, input_features=1)
    kparams = prepare_kernel_params(params)

    trigger = jax.random.normal(k_trig, (2, 8), jnp.float32)   # B = 16 elements

    result, hidden = rnn_synthesizer_forward(trigger, kparams, noise_key=k_noise)
    jax.block_until_ready(result)
    jax.block_until_ready(hidden)

    assert result.shape == trigger.shape
    assert hidden.shape == (NLAYERS, trigger.size, NHID)
    assert bool(jnp.all(jnp.isfinite(result)))
    assert bool(jnp.all(jnp.isfinite(hidden)))
    print("KERNEL_OK")
</pallas_src>

<mosaic_0001>
module attributes {stable_mosaic.version = 11 : i64} {
  func.func @kernel(%arg0: i32, %arg1: memref<32x8xf32, #tpu.memory_space<vmem>>, %arg2: memref<32x8xf32, #tpu.memory_space<vmem>>, %arg3: memref<8x384xf32, #tpu.memory_space<vmem>>, %arg4: memref<1x128x384xbf16, #tpu.memory_space<vmem>>, %arg5: memref<2x1x384xf32, #tpu.memory_space<vmem>>, %arg6: memref<2x1x128xf32, #tpu.memory_space<vmem>>, %arg7: memref<128x4xf32, #tpu.memory_space<vmem>>, %arg8: memref<1x1xf32, #tpu.memory_space<vmem>>, %arg9: memref<32x4xf32, #tpu.memory_space<vmem>>, %arg10: memref<2x32x128xf32, #tpu.memory_space<vmem>>) attributes {dimension_semantics = [#tpu.dimension_semantics<parallel>], iteration_bounds = array<i64: 1>, scalar_prefetch = 0 : i64, scratch_operands = 0 : i64, tpu.core_type = #tpu.core_type<tc>, window_params = [{transform_indices = @transform_0, window_bounds = array<i64: 32, 8>}, {transform_indices = @transform_1, window_bounds = array<i64: 32, 8>}, {pipeline_mode = #tpu.pipeline_mode<synchronous>, transform_indices = @transform_2, window_bounds = array<i64: 8, 384>}, {pipeline_mode = #tpu.pipeline_mode<synchronous>, transform_indices = @transform_3, window_bounds = array<i64: 1, 128, 384>}, {pipeline_mode = #tpu.pipeline_mode<synchronous>, transform_indices = @transform_4, window_bounds = array<i64: 2, 1, 384>}, {pipeline_mode = #tpu.pipeline_mode<synchronous>, transform_indices = @transform_5, window_bounds = array<i64: 2, 1, 128>}, {pipeline_mode = #tpu.pipeline_mode<synchronous>, transform_indices = @transform_6, window_bounds = array<i64: 128, 4>}, {pipeline_mode = #tpu.pipeline_mode<synchronous>, transform_indices = @transform_7, window_bounds = array<i64: 1, 1>}, {transform_indices = @transform_8, window_bounds = array<i64: 32, 4>}, {transform_indices = @transform_9, window_bounds = array<i64: 2, 32, 128>}]} {
    %c0 = arith.constant 0 : index
    %c0_0 = arith.constant 0 : index
    %0 = vector.load %arg1[%c0, %c0_0] : memref<32x8xf32, #tpu.memory_space<vmem>>, vector<32x8xf32>
    %c0_1 = arith.constant 0 : index
    %c0_2 = arith.constant 0 : index
    %1 = vector.load %arg2[%c0_1, %c0_2] : memref<32x8xf32, #tpu.memory_space<vmem>>, vector<32x8xf32>
    %2 = arith.mulf %0, %1 : vector<32x8xf32>
    %c0_3 = arith.constant 0 : index
    %c0_4 = arith.constant 0 : index
    %3 = vector.load %arg3[%c0_3, %c0_4] : memref<8x384xf32, #tpu.memory_space<vmem>>, vector<8x384xf32>
    %cst = arith.constant dense<0.000000e+00> : vector<32x384xf32>
    %4 = tpu.matmul %2, %3, %cst {dimension_numbers = #tpu.dot_dimension_numbers<[1], [0], [0], [1], [0, 0, 1, 1], [], []>} : vector<32x8xf32>, vector<8x384xf32>, vector<32x384xf32> -> vector<32x384xf32>
    %c0_5 = arith.constant 0 : index
    %c0_6 = arith.constant 0 : index
    %c0_7 = arith.constant 0 : index
    %5 = vector.load %arg5[%c0_5, %c0_6, %c0_7] : memref<2x1x384xf32, #tpu.memory_space<vmem>>, vector<1x1x384xf32>
    %6 = vector.shape_cast %5 : vector<1x1x384xf32> to vector<1x384xf32>
    %7 = vector.broadcast %6 : vector<1x384xf32> to vector<32x384xf32>
    %8 = arith.addf %4, %7 : vector<32x384xf32>
    %9 = vector.extract_strided_slice %8 {offsets = [0, 0], sizes = [32, 128], strides = [1, 1]} : vector<32x384xf32> to vector<32x128xf32>
    %10 = arith.negf %9 : vector<32x128xf32>
    %11 = math.exp %10 : vector<32x128xf32>
    %cst_8 = arith.constant 1.000000e+00 : f32
    %12 = vector.broadcast %cst_8 : f32 to vector<32x128xf32>
    %13 = arith.addf %12, %11 : vector<32x128xf32>
    %14 = arith.divf %12, %13 : vector<32x128xf32>
    %15 = vector.extract_strided_slice %8 {offsets = [0, 128], sizes = [32, 128], strides = [1, 1]} : vector<32x384xf32> to vector<32x128xf32>
    %16 = arith.negf %15 : vector<32x128xf32>
    %17 = math.exp %16 : vector<32x128xf32>
    %cst_9 = arith.constant 1.000000e+00 : f32
    %18 = vector.broadcast %cst_9 : f32 to vector<32x128xf32>
    %19 = arith.addf %18, %17 : vector<32x128xf32>
    %20 = arith.divf %18, %19 : vector<32x128xf32>
    %21 = vector.extract_strided_slice %8 {offsets = [0, 256], sizes = [32, 128], strides = [1, 1]} : vector<32x384xf32> to vector<32x128xf32>
    %c0_10 = arith.constant 0 : index
    %c0_11 = arith.constant 0 : index
    %c0_12 = arith.constant 0 : index
    %22 = vector.load %arg6[%c0_10, %c0_11, %c0_12] : memref<2x1x128xf32, #tpu.memory_space<vmem>>, vector<1x1x128xf32>
    %23 = vector.shape_cast %22 : vector<1x1x128xf32> to vector<1x128xf32>
    %24 = vector.broadcast %23 : vector<1x128xf32> to vector<32x128xf32>
    %25 = arith.mulf %14, %24 : vector<32x128xf32>
    %26 = arith.addf %21, %25 : vector<32x128xf32>
    %27 = math.tanh %26 : vector<32x128xf32>
    %cst_13 = arith.constant 1.000000e+00 : f32
    %28 = vector.broadcast %cst_13 : f32 to vector<32x128xf32>
    %29 = arith.subf %28, %20 : vector<32x128xf32>
    %30 = arith.mulf %29, %27 : vector<32x128xf32>
    %c0_14 = arith.constant 0 : index
    %c0_15 = arith.constant 0 : index
    %c0_16 = arith.constant 0 : index
    %31 = vector.load %arg10[%c0_14, %c0_15, %c0_16] : memref<2x32x128xf32, #tpu.memory_space<vmem>>, vector<1x32x128xf32>
    %32 = vector.shape_cast %31 : vector<1x32x128xf32> to vector<32x128xf32>
    %33 = vector.shape_cast %30 : vector<32x128xf32> to vector<1x32x128xf32>
    tpu.vector_store %arg10[%c0_14, %c0_15, %c0_16], %33 {strides = array<i32>} : memref<2x32x128xf32, #tpu.memory_space<vmem>>, vector<1x32x128xf32>,
    %34 = arith.truncf %30 : vector<32x128xf32> to vector<32x128xbf16>
    %c0_17 = arith.constant 0 : index
    %c0_18 = arith.constant 0 : index
    %c0_19 = arith.constant 0 : index
    %35 = vector.load %arg4[%c0_17, %c0_18, %c0_19] : memref<1x128x384xbf16, #tpu.memory_space<vmem>>, vector<1x128x384xbf16>
    %36 = vector.shape_cast %35 : vector<1x128x384xbf16> to vector<128x384xbf16>
    %cst_20 = arith.constant dense<0.000000e+00> : vector<32x384xf32>
    %37 = tpu.matmul %34, %36, %cst_20 {dimension_numbers = #tpu.dot_dimension_numbers<[1], [0], [0], [1], [0, 0, 1, 1], [], []>} : vector<32x128xbf16>, vector<128x384xbf16>, vector<32x384xf32> -> vector<32x384xf32>
    %c1 = arith.constant 1 : index
    %c0_21 = arith.constant 0 : index
    %c0_22 = arith.constant 0 : index
    %38 = vector.load %arg5[%c1, %c0_21, %c0_22] : memref<2x1x384xf32, #tpu.memory_space<vmem>>, vector<1x1x384xf32>
    %39 = vector.shape_cast %38 : vector<1x1x384xf32> to vector<1x384xf32>
    %40 = vector.broadcast %39 : vector<1x384xf32> to vector<32x384xf32>
    %41 = arith.addf %37, %40 : vector<32x384xf32>
    %42 = vector.extract_strided_slice %41 {offsets = [0, 0], sizes = [32, 128], strides = [1, 1]} : vector<32x384xf32> to vector<32x128xf32>
    %43 = arith.negf %42 : vector<32x128xf32>
    %44 = math.exp %43 : vector<32x128xf32>
    %cst_23 = arith.constant 1.000000e+00 : f32
    %45 = vector.broadcast %cst_23 : f32 to vector<32x128xf32>
    %46 = arith.addf %45, %44 : vector<32x128xf32>
    %47 = arith.divf %45, %46 : vector<32x128xf32>
    %48 = vector.extract_strided_slice %41 {offsets = [0, 128], sizes = [32, 128], strides = [1, 1]} : vector<32x384xf32> to vector<32x128xf32>
    %49 = arith.negf %48 : vector<32x128xf32>
    %50 = math.exp %49 : vector<32x128xf32>
    %cst_24 = arith.constant 1.000000e+00 : f32
    %51 = vector.broadcast %cst_24 : f32 to vector<32x128xf32>
    %52 = arith.addf %51, %50 : vector<32x128xf32>
    %53 = arith.divf %51, %52 : vector<32x128xf32>
    %54 = vector.extract_strided_slice %41 {offsets = [0, 256], sizes = [32, 128], strides = [1, 1]} : vector<32x384xf32> to vector<32x128xf32>
    %c1_25 = arith.constant 1 : index
    %c0_26 = arith.constant 0 : index
    %c0_27 = arith.constant 0 : index
    %55 = vector.load %arg6[%c1_25, %c0_26, %c0_27] : memref<2x1x128xf32, #tpu.memory_space<vmem>>, vector<1x1x128xf32>
    %56 = vector.shape_cast %55 : vector<1x1x128xf32> to vector<1x128xf32>
    %57 = vector.broadcast %56 : vector<1x128xf32> to vector<32x128xf32>
    %58 = arith.mulf %47, %57 : vector<32x128xf32>
    %59 = arith.addf %54, %58 : vector<32x128xf32>
    %60 = math.tanh %59 : vector<32x128xf32>
    %cst_28 = arith.constant 1.000000e+00 : f32
    %61 = vector.broadcast %cst_28 : f32 to vector<32x128xf32>
    %62 = arith.subf %61, %53 : vector<32x128xf32>
    %63 = arith.mulf %62, %60 : vector<32x128xf32>
    %c1_29 = arith.constant 1 : index
    %c0_30 = arith.constant 0 : index
    %c0_31 = arith.constant 0 : index
    %64 = vector.load %arg10[%c1_29, %c0_30, %c0_31] : memref<2x32x128xf32, #tpu.memory_space<vmem>>, vector<1x32x128xf32>
    %65 = vector.shape_cast %64 : vector<1x32x128xf32> to vector<32x128xf32>
    %66 = vector.shape_cast %63 : vector<32x128xf32> to vector<1x32x128xf32>
    tpu.vector_store %arg10[%c1_29, %c0_30, %c0_31], %66 {strides = array<i32>} : memref<2x32x128xf32, #tpu.memory_space<vmem>>, vector<1x32x128xf32>,
    %c0_32 = arith.constant 0 : index
    %c0_33 = arith.constant 0 : index
    %67 = vector.load %arg7[%c0_32, %c0_33] : memref<128x4xf32, #tpu.memory_space<vmem>>, vector<128x4xf32>
    %cst_34 = arith.constant dense<0.000000e+00> : vector<32x4xf32>
    %68 = tpu.matmul %63, %67, %cst_34 {dimension_numbers = #tpu.dot_dimension_numbers<[1], [0], [0], [1], [0, 0, 1, 1], [], []>} : vector<32x128xf32>, vector<128x4xf32>, vector<32x4xf32> -> vector<32x4xf32>
    %c0_35 = arith.constant 0 : index
    %c0_36 = arith.constant 0 : index
    %69 = vector.load %arg8[%c0_35, %c0_36] : memref<1x1xf32, #tpu.memory_space<vmem>>, vector<1x1xf32>
    %70 = vector.broadcast %69 : vector<1x1xf32> to vector<32x4xf32>
    %71 = arith.addf %68, %70 : vector<32x4xf32>
    %c0_37 = arith.constant 0 : index
    %c0_38 = arith.constant 0 : index
    %72 = vector.load %arg9[%c0_37, %c0_38] : memref<32x4xf32, #tpu.memory_space<vmem>>, vector<32x4xf32>
    tpu.vector_store %arg9[%c0_37, %c0_38], %71 {strides = array<i32>} : memref<32x4xf32, #tpu.memory_space<vmem>>, vector<32x4xf32>,
    return
  }
  func.func @transform_0(%arg0: i32) -> (i32, i32) {
    %c0_i32 = arith.constant 0 : i32
    %c0_i32_0 = arith.constant 0 : i32
    return %arg0, %c0_i32 : i32, i32
  }
  func.func @transform_1(%arg0: i32) -> (i32, i32) {
    %c0_i32 = arith.constant 0 : i32
    %c0_i32_0 = arith.constant 0 : i32
    return %arg0, %c0_i32 : i32, i32
  }
  func.func @transform_2(%arg0: i32) -> (i32, i32) {
    %c0_i32 = arith.constant 0 : i32
    %c0_i32_0 = arith.constant 0 : i32
    %c0_i32_1 = arith.constant 0 : i32
    return %c0_i32, %c0_i32_0 : i32, i32
  }
  func.func @transform_3(%arg0: i32) -> (i32, i32, i32) {
    %c0_i32 = arith.constant 0 : i32
    %c0_i32_0 = arith.constant 0 : i32
    %c0_i32_1 = arith.constant 0 : i32
    %c0_i32_2 = arith.constant 0 : i32
    return %c0_i32, %c0_i32_0, %c0_i32_1 : i32, i32, i32
  }
  func.func @transform_4(%arg0: i32) -> (i32, i32, i32) {
    %c0_i32 = arith.constant 0 : i32
    %c0_i32_0 = arith.constant 0 : i32
    %c0_i32_1 = arith.constant 0 : i32
    %c0_i32_2 = arith.constant 0 : i32
    return %c0_i32, %c0_i32_0, %c0_i32_1 : i32, i32, i32
  }
  func.func @transform_5(%arg0: i32) -> (i32, i32, i32) {
    %c0_i32 = arith.constant 0 : i32
    %c0_i32_0 = arith.constant 0 : i32
    %c0_i32_1 = arith.constant 0 : i32
    %c0_i32_2 = arith.constant 0 : i32
    return %c0_i32, %c0_i32_0, %c0_i32_1 : i32, i32, i32
  }
  func.func @transform_6(%arg0: i32) -> (i32, i32) {
    %c0_i32 = arith.constant 0 : i32
    %c0_i32_0 = arith.constant 0 : i32
    %c0_i32_1 = arith.constant 0 : i32
    return %c0_i32, %c0_i32_0 : i32, i32
  }
  func.func @transform_7(%arg0: i32) -> (i32, i32) {
    %c0_i32 = arith.constant 0 : i32
    %c0_i32_0 = arith.constant 0 : i32
    %c0_i32_1 = arith.constant 0 : i32
    return %c0_i32, %c0_i32_0 : i32, i32
  }
  func.func @transform_8(%arg0: i32) -> (i32, i32) {
    %c0_i32 = arith.constant 0 : i32
    %c0_i32_0 = arith.constant 0 : i32
    return %arg0, %c0_i32 : i32, i32
  }
  func.func @transform_9(%arg0: i32) -> (i32, i32, i32) {
    %c0_i32 = arith.constant 0 : i32
    %c0_i32_0 = arith.constant 0 : i32
    %c0_i32_1 = arith.constant 0 : i32
    return %c0_i32, %arg0, %c0_i32_0 : i32, i32, i32
  }
}

</mosaic_0001>

<bundles_post_ra>
// kernel: tpu_custom_call.1
= control target key start
LH: loop header
LB: loop body
LE: loop exit
PB: predicated region body
PF: predicated region fallthrough
CT: control target
= control target key end

     0   :  { %s1454_s0 = inlined_call_operand.vmem [shape: f32[32,8], index: 0, kind: input, shape index: {}]   ;;  %s1455_s1 = inlined_call_operand.vmem [shape: f32[32,8], index: 1, kind: input, shape index: {}]   ;;  %s1456_s2 = inlined_call_operand.vmem [shape: f32[8,384], index: 2, kind: input, shape index: {}]   ;;  %s1457_s3 = inlined_call_operand.vmem [shape: bf16[1,128,384], index: 3, kind: input, shape index: {}]   ;;  %s1458_s4 = inlined_call_operand.vmem [shape: f32[2,1,384], index: 4, kind: input, shape index: {}]   ;;  %s1459_s5 = inlined_call_operand.vmem [shape: f32[2,1,128], index: 5, kind: input, shape index: {}]   ;;  %s1460_s6 = inlined_call_operand.vmem [shape: f32[128,4], index: 6, kind: input, shape index: {}]   ;;  %s1461_s7 = inlined_call_operand.<no memory space> [shape: f32[1,1], index: 7, kind: input, shape index: {}]   ;;  %s1462_s8 = inlined_call_operand.vmem [shape: f32[32,4], index: 8, kind: output, shape index: {0}]   ;;  %s1463_s9 = inlined_call_operand.hbm [shape: f32[2,32,128], index: 9, kind: output, shape index: {1}]  }
   0x1   :  { %v15_v0 = vstv %s1461_s7 }
   0x2   :  { %16 = vst [vmem:[#allocation2] sm:$0x1] %v15_v0 }
   0x3   :  { %v48_v1 = vld [vmem:[%s1456_s2 + $0x8] sm:$0xff]  ;;  %v47_v2 = vld [vmem:[%s1456_s2] sm:$0xff]  ;;  %v1176_v4 = vmov 0.0   ;;  %vm67_vm0 = vcmask 64512   ;;  %v37_v9 = vld [vmem:[%s1454_s0 + $0x10] sm:$0xff] }
   0x4   :  { %v35_v3 = vld [vmem:[%s1454_s0] sm:$0xff]  ;;  %80 = vmatprep.subr.mxu0 %v48_v1  ;;  %144 = vmatprep.mubr.f32.mxu0 %v1176_v4  ;;  %v36_v6 = vld [vmem:[%s1454_s0 + $0x8] sm:$0xff]  ;;  %v41_v10 = vld [vmem:[%s1455_s1 + $0x10] sm:$0xff] }
   0x5   :  { %v39_v5 = vld [vmem:[%s1455_s1] sm:$0xff]  ;;  %v40_v7 = vld [vmem:[%s1455_s1 + $0x8] sm:$0xff]  ;;  %81 = vmatpush1.msra.mxu0 %v47_v2  ;;  %v49_v11 = vld [vmem:[%s1456_s2 + $0x10] sm:$0xff]  ;;  %v45_v15 = vmul.f32 %v41_v10, %v37_v9 }
   0x6   :  { %v43_v8 = vmul.f32 %v39_v5, %v35_v3  ;;  %v44_v12 = vmul.f32 %v40_v7, %v36_v6  ;;  %v38_v13 = vld [vmem:[%s1454_s0 + $0x18] sm:$0xff]  ;;  %920 = vmatprep.subr.mxu1 %v49_v11 }
   0x7   :  { %v42_v14 = vld [vmem:[%s1455_s1 + $0x18] sm:$0xff]  ;;  %921 = vmatpush3.msra.mxu1 %v49_v11 }
   0x8   :  { %832 = vmatmul.mubr.msk.f32.vlgmr.msra.gmra.mrb[0].mxu0 %vm67_vm0, %v43_v8  ;;  %922 = vmatprep.mubr.msk.f32.mxu1 %vm67_vm0, %v43_v8  ;;  %v46_v16 = vmul.f32 %v42_v14, %v38_v13 }
   0x9   :  { %150 = vmatprep.mubr.f32.mxu0 %v1176_v4  ;;  %923 = vmatmul.mubr.msk.f32.vlgmr.msra.gmra.mrb[0].mxu1 %vm67_vm0, %v44_v12 }
   0xa   :  { %925 = vmatprep.mubr.msk.f32.mxu1 %vm67_vm0, %v45_v15 }
   0xc   :  { %833 = vmatmul.mubr.msk.f32.gmra.mrb[2].mxu0 %vm67_vm0, %v44_v12 }
   0xd   :  { %156 = vmatprep.mubr.f32.mxu0 %v1176_v4  ;;  %926 = vmatmul.mubr.msk.f32.gmra.mrb[2].mxu1 %vm67_vm0, %v46_v16 }
  0x10   :  { %834 = vmatmul.mubr.msk.f32.gmra.mrb[4].mxu0 %vm67_vm0, %v45_v15 }
  0x11   :  { %162 = vmatprep.mubr.f32.mxu0 %v1176_v4 }
  0x12   :  { %17 = vsyncpa [#allocation4], 0  ;;  %v1042_v17 = vld [vmem:[%s1457_s3 + $0x4] ss:$12 sps:$4 sm:$0xff]   ;;  %v1040_v18 = vld [vmem:[%s1457_s3] ss:$12 sps:$4 sm:$0xff]   ;;  %v52_v42 = vlaneseq }
  0x13   :  { %513 = vmatprep.subr.bf16.mxu0 %v1042_v17  ;;  %v1045_v19 = vld [vmem:[%s1457_s3 + $0x1c] ss:$12 sps:$4 sm:$0xff]   ;;  %v1043_v20 = vld [vmem:[%s1457_s3 + $0x18] ss:$12 sps:$4 sm:$0xff]   ;;  %v1048_v21 = vld [vmem:[%s1457_s3 + $0x34] ss:$12 sps:$4 sm:$0xff]  }
  0x14   :  { %835 = vmatmul.mubr.msk.f32.gmra.mrb[6].mxu0 %vm67_vm0, %v46_v16  ;;  %v1049_v22 = vld [vmem:[%s1457_s3 + $0x8] ss:$12 sps:$4 sm:$0xff]   ;;  %v1046_v23 = vld [vmem:[%s1457_s3 + $0x30] ss:$12 sps:$4 sm:$0xff]   ;;  %v1052_v24 = vld [vmem:[%s1457_s3 + $0x4c] ss:$12 sps:$4 sm:$0xff]  }
  0x15   :  { %514 = vmatpush1.bf16.msra.mxu0 %v1040_v18  ;;  %928 = vmatprep.subr.bf16.mxu1 %v1049_v22  ;;  %v1053_v25 = vld [vmem:[%s1457_s3 + $0x20] ss:$12 sps:$4 sm:$0xff]   ;;  %v1050_v26 = vld [vmem:[%s1457_s3 + $0x48] ss:$12 sps:$4 sm:$0xff]   ;;  %v1056_v27 = vld [vmem:[%s1457_s3 + $0x64] ss:$12 sps:$4 sm:$0xff]  }
  0x16   :  { %515 = vmatprep.subr.bf16.mxu0 %v1045_v19  ;;  %929 = vmatpush3.bf16.msra.mxu1 %v1049_v22  ;;  %v1057_v28 = vld [vmem:[%s1457_s3 + $0x38] ss:$12 sps:$4 sm:$0xff]   ;;  %v1054_v29 = vld [vmem:[%s1457_s3 + $0x60] ss:$12 sps:$4 sm:$0xff]   ;;  %v1060_v30 = vld [vmem:[%s1457_s3 + $0x7c] ss:$12 sps:$4 sm:$0xff]  }
  0x17   :  { %930 = vmatprep.subr.bf16.mxu1 %v1053_v25  ;;  %v1061_v31 = vld [vmem:[%s1457_s3 + $0x50] ss:$12 sps:$4 sm:$0xff]   ;;  %v1058_v32 = vld [vmem:[%s1457_s3 + $0x78] ss:$12 sps:$4 sm:$0xff]   ;;  %v1064_v33 = vld [vmem:[%s1457_s3 + $0x94] ss:$12 sps:$4 sm:$0xff]  }
  0x18   :  { %v1065_v34 = vld [vmem:[%s1457_s3 + $0x68] ss:$12 sps:$4 sm:$0xff]   ;;  %v1062_v35 = vld [vmem:[%s1457_s3 + $0x90] ss:$12 sps:$4 sm:$0xff]   ;;  %v1068_v36 = vld [vmem:[%s1457_s3 + $0xac] ss:$12 sps:$4 sm:$0xff]  }
  0x19   :  { %516 = vmatpush1.bf16.msra.mxu0 %v1043_v20  ;;  %v1069_v37 = vld [vmem:[%s1457_s3 + $0x80] ss:$12 sps:$4 sm:$0xff]   ;;  %v1066_v38 = vld [vmem:[%s1457_s3 + $0xa8] ss:$12 sps:$4 sm:$0xff]   ;;  %v1177_v39 = vmov 0   ;;  %v1349_v43 = vshrl.u32 %v52_v42, 7 }
  0x1a   :  { %517 = vmatprep.subr.bf16.mxu0 %v1048_v21  ;;  %931 = vmatpush3.bf16.msra.mxu1 %v1053_v25  ;;  %v1070_v40 = vld [vmem:[%s1457_s3 + $0x98] ss:$12 sps:$4 sm:$0xff]   ;;  %v1071_v41 = vld [vmem:[%s1457_s3 + $0xb0] ss:$12 sps:$4 sm:$0xff]   ;;  %v50_v45 = vld [vmem:[%s1458_s4] sm:$0x7] }
  0x1b   :  { %932 = vmatprep.subr.bf16.mxu1 %v1057_v28  ;;  %545 = vmatprep.mubr.bf16.mxu0 %v1177_v39  ;;  %v54_v44 = vsub.s32 0, %v1349_v43  ;;  %v58_v46 = vsub.s32 1, %v1349_v43  ;;  %v62_v16 = vsub.s32 2, %v1349_v43 }
  0x1c   :  { %1039 = vset.pattern.permute.xlu0 %v1177_v39 }
  0x1d   :  { %518 = vmatpush1.bf16.msra.mxu0 %v1046_v23  ;;  %v55_v47 = vrot.slane %v50_v45, %v54_v44  ;;  %v59_v49 = vrot.slane %v50_v45, %v58_v46  ;;  %v63_v20 = vrot.slane %v50_v45, %v62_v16 }
  0x1e   :  { %519 = vmatprep.subr.bf16.mxu0 %v1052_v24  ;;  %933 = vmatpush3.bf16.msra.mxu1 %v1057_v28  ;;  %v848_v24 = vld [vmem:[%s1459_s5] ss:$0 sm:$0xff] }
  0x1f   :  { %934 = vmatprep.subr.bf16.mxu1 %v1061_v31 }
  0x21   :  { %520 = vmatpush1.bf16.msra.mxu0 %v1050_v26 }
  0x22   :  { %521 = vmatprep.subr.bf16.mxu0 %v1056_v27  ;;  %935 = vmatpush3.bf16.msra.mxu1 %v1061_v31 }
  0x23   :  { %936 = vmatprep.subr.bf16.mxu1 %v1065_v34 }
  0x25   :  { %522 = vmatpush1.bf16.msra.mxu0 %v1054_v29 }
  0x26   :  { %523 = vmatprep.subr.bf16.mxu0 %v1060_v30  ;;  %937 = vmatpush3.bf16.msra.mxu1 %v1065_v34 }
  0x27   :  { %938 = vmatprep.subr.bf16.mxu1 %v1069_v37 }
  0x29   :  { %524 = vmatpush1.bf16.msra.mxu0 %v1058_v32 }
  0x2a   :  { %525 = vmatprep.subr.bf16.mxu0 %v1064_v33  ;;  %939 = vmatpush3.bf16.msra.mxu1 %v1069_v37 }
  0x2b   :  { %940 = vmatprep.subr.bf16.mxu1 %v1070_v40 }
  0x2d   :  { %526 = vmatpush1.bf16.msra.mxu0 %v1062_v35 }
  0x2e   :  { %527 = vmatprep.subr.bf16.mxu0 %v1068_v36  ;;  %941 = vmatpush3.bf16.msra.mxu1 %v1070_v40 }
  0x2f   :  { %942 = vmatprep.subr.bf16.mxu1 %v1071_v41 }
  0x31   :  { %528 = vmatpush1.bf16.msra.mxu0 %v1066_v38 }
  0x32   :  { %943 = vmatpush3.bf16.msra.mxu1 %v1071_v41 }
  0xdb   :  { %v146_v48 = vpop.f32.mrb[0].mxu0 }
  0xdc   :  { %v147_v50 = vadd.f32 %v146_v48, %v55_v47  ;;  %v148_v51 = vpop.f32.mrb[1].mxu0  ;;  %v924_v53 = vpop.f32.mrb[0].mxu1 }
  0xdd   :  { %v149_v54 = vadd.f32 %v148_v51, %v59_v49  ;;  %v235_v56 = vpop.f32.mrb[1].mxu1  ;;  %v241_v32 = vadd.f32 %v924_v53, %v63_v20 }
  0xde   :  { %v840_v52 = vmul.f32 -1.442695, %v147_v50  ;;  %v236_v26 = vadd.f32 %v235_v56, %v63_v20 }
  0xdf   :  { %v152_v55 = vpop.f32.mrb[2].mxu0  ;;  %v844_v61 = vmul.f32 -1.442695, %v149_v54 }
  0xe0   :  { %1072 = vpow2.f32 %v840_v52  ;;  %v153_v57 = vadd.f32 %v152_v55, %v55_v47  ;;  %v154_v58 = vpop.f32.mrb[3].mxu0  ;;  %v1360_v60 = vpop.f32.mrb[2].mxu1 }
  0xe1   :  { %v155_v62 = vadd.f32 %v154_v58, %v59_v49  ;;  %v245_v0 = vpop.f32.mrb[3].mxu1  ;;  %v251_v48 = vadd.f32 %v1360_v60, %v63_v20 }
  0xe2   :  { %v841_v59 = vmul.f32 -1.442695, %v153_v57  ;;  %v246_v40 = vadd.f32 %v245_v0, %v63_v20 }
  0xe3   :  { %v158_v63 = vpop.f32.mrb[4].mxu0  ;;  %v845_v5 = vmul.f32 -1.442695, %v155_v62 }
  0xe4   :  { %1074 = vpow2.f32 %v841_v59  ;;  %v159_v1 = vadd.f32 %v158_v63, %v55_v47  ;;  %v160_v2 = vpop.f32.mrb[5].mxu0 }
  0xe5   :  { %v161_v4 = vadd.f32 %v160_v2, %v59_v49  ;;  %1076 = vpow2.f32 %v844_v61 }
  0xe6   :  { %v842_v3 = vmul.f32 -1.442695, %v159_v1 }
  0xe7   :  { %v164_v6 = vpop.f32.mrb[6].mxu0  ;;  %v846_v10 = vmul.f32 -1.442695, %v161_v4 }
  0xe8   :  { %1078 = vpow2.f32 %v842_v3  ;;  %v165_v7 = vadd.f32 %v164_v6, %v55_v47  ;;  %v166_v8 = vpop.f32.mrb[7].mxu0  ;;  %v696_v6 = vld [vmem:[%s1460_s6] sm:$0xff] }
  0xe9   :  { %v167_v12 = vadd.f32 %v166_v8, %v59_v49  ;;  %1080 = vpow2.f32 %v845_v5 }
  0xea   :  { %v1073_v9 = vpop.eup %1072  ;;  %v843_v11 = vmul.f32 -1.442695, %v165_v7  ;;  %v697_v7 = vld [vmem:[%s1460_s6 + $0x8] sm:$0xff] }
  0xeb   :  { %v266_v13 = vadd.f32 1.0, %v1073_v9  ;;  %v847_v15 = vmul.f32 -1.442695, %v167_v12  ;;  %v986_v8 = vpack.c.bf16 %v697_v7, %v696_v6  ;;  %v699_v9 = vld [vmem:[%s1460_s6 + $0x18] sm:$0xff]  ;;  %v701_v12 = vld [vmem:[%s1460_s6 + $0x28] sm:$0xff] }
  0xec   :  { %1082 = vpow2.f32 %v843_v11  ;;  %v700_v11 = vld [vmem:[%s1460_s6 + $0x20] sm:$0xff] }
  0xed   :  { %1084 = vrcp.f32 %v266_v13  ;;  %987 = vmatprep.subr.bf16.mxu0 %v986_v8  ;;  %1018 = vmatprep.subr.bf16.mxu1 %v986_v8  ;;  %v994_v13 = vpack.c.bf16 %v701_v12, %v700_v11 }
  0xee   :  { %v1075_v14 = vpop.eup %1074  ;;  %1086 = vpow2.f32 %v846_v10 }
  0xef   :  { %v267_v17 = vadd.f32 1.0, %v1075_v14  ;;  %v1077_v18 = vpop.eup %1076  ;;  %v702_v14 = vld [vmem:[%s1460_s6 + $0x30] sm:$0xff] }
  0xf0   :  { %v290_v22 = vadd.f32 1.0, %v1077_v18  ;;  %v704_v18 = vld [vmem:[%s1460_s6 + $0x40] sm:$0xff] }
  0xf1   :  { %1088 = vrcp.f32 %v267_v17 }
  0xf2   :  { %v1079_v19 = vpop.eup %1078  ;;  %1090 = vpow2.f32 %v847_v15  ;;  %v703_v15 = vld [vmem:[%s1460_s6 + $0x38] sm:$0xff] }
  0xf3   :  { %v268_v21 = vadd.f32 1.0, %v1079_v19  ;;  %v1081_v23 = vpop.eup %1080  ;;  %v998_v17 = vpack.c.bf16 %v703_v15, %v702_v14  ;;  %v705_v19 = vld [vmem:[%s1460_s6 + $0x48] sm:$0xff] }
  0xf4   :  { %v291_v30 = vadd.f32 1.0, %v1081_v23  ;;  %v1002_v20 = vpack.c.bf16 %v705_v19, %v704_v18 }
  0xf5   :  { %1092 = vrcp.f32 %v268_v21  ;;  %v706_v21 = vld [vmem:[%s1460_s6 + $0x50] sm:$0xff] }
  0xf6   :  { %v1083_v25 = vpop.eup %1082  ;;  %1094 = vrcp.f32 %v290_v22  ;;  %v707_v22 = vld [vmem:[%s1460_s6 + $0x58] sm:$0xff] }
  0xf7   :  { %v1085_v27 = vpop.eup %1084  ;;  %v269_v28 = vadd.f32 1.0, %v1083_v25  ;;  %v1006_v23 = vpack.c.bf16 %v707_v22, %v706_v21  ;;  %v709_v25 = vld [vmem:[%s1460_s6 + $0x68] sm:$0xff] }
  0xf8   :  { %v1087_v29 = vpop.eup %1086  ;;  %v309_v31 = vmul.f32 %v1085_v27, %v848_v24  ;;  %v710_v27 = vld [vmem:[%s1460_s6 + $0x70] sm:$0xff] }
  0xf9   :  { %1096 = vrcp.f32 %v269_v28  ;;  %v292_v35 = vadd.f32 1.0, %v1087_v29  ;;  %v711_v28 = vld [vmem:[%s1460_s6 + $0x78] sm:$0xff] }
  0xfa   :  { %v313_v33 = vadd.f32 %v309_v31, %v236_v26  ;;  %1098 = vrcp.f32 %v291_v30  ;;  %v1014_v29 = vpack.c.bf16 %v711_v28, %v710_v27  ;;  %v884_v30 = vld [vmem:[#allocation2] ss:$0 sm:$0xff]  ;;  %v849_v31 = vld [vmem:[%s1458_s4 + $0x3] sm:$0x7] }
  0xfb   :  { %v1089_v34 = vpop.eup %1088  ;;  %719 = vperm.xlu0 %1039, %v884_v30  }
  0xfc   :  { %v1091_v36 = vpop.eup %1090  ;;  %v310_v37 = vmul.f32 %v1089_v34, %v848_v24  ;;  %1100 = vtanh.f32 %v313_v33  ;;  %v377_v34 = vrot.slane %v849_v31, %v58_v46 }
  0xfd   :  { %1102 = vrcp.f32 %v292_v35  ;;  %v293_v42 = vadd.f32 1.0, %v1091_v36 }
  0xfe   :  { %v314_v38 = vadd.f32 %v310_v37, %v241_v32  ;;  %v373_v32 = vrot.slane %v849_v31, %v54_v44 }
  0xff   :  { %v1093_v41 = vpop.eup %1092 }
 0x100   :  { %1104 = vtanh.f32 %v314_v38  ;;  %v311_v45 = vmul.f32 %v1093_v41, %v848_v24  ;;  %v1095_v47 = vpop.eup %1094 }
 0x101   :  { %1106 = vrcp.f32 %v293_v42  ;;  %v321_v53 = vsub.f32 1.0, %v1095_v47 }
 0x102   :  { %v315_v49 = vadd.f32 %v311_v45, %v246_v40 }
 0x103   :  { %v1097_v50 = vpop.eup %1096 }
 0x104   :  { %v312_v51 = vmul.f32 %v1097_v50, %v848_v24  ;;  %1108 = vtanh.f32 %v315_v49  ;;  %v1099_v52 = vpop.eup %1098  ;;  %v708_v24 = vld [vmem:[%s1460_s6 + $0x60] sm:$0xff] }
 0x105   :  { %v322_v58 = vsub.f32 1.0, %v1099_v52  ;;  %v1010_v26 = vpack.c.bf16 %v709_v25, %v708_v24 }
 0x106   :  { %v316_v54 = vadd.f32 %v312_v51, %v251_v48  ;;  %v1101_v55 = vpop.eup %1100 }
 0x107   :  { %v325_v56 = vmul.f32 %v1101_v55, %v321_v53  ;;  %v1103_v57 = vpop.eup %1102 }
 0x108   :  { %1110 = vtanh.f32 %v316_v54  ;;  %v323_v63 = vsub.f32 1.0, %v1103_v57 }
 0x109   :  { %329 = vst [vmem:[#allocation3] sm:$0xff] %v325_v56 }
 0x10a   :  { %v1105_v59 = vpop.eup %1104 }
 0x10b   :  { %v326_v61 = vmul.f32 %v1105_v59, %v322_v58  ;;  %v1107_v62 = vpop.eup %1106 }
 0x10c   :  { %v324_v2 = vsub.f32 1.0, %v1107_v62 }
 0x10d   :  { %330 = vst [vmem:[#allocation3 + $0x8] sm:$0xff] %v326_v61  ;;  %v333_v60 = vpack.c.bf16 %v326_v61, %v325_v56 }
 0x10e   :  { %v1109_v0 = vpop.eup %1108 }
 0x10f   :  { %546 = vmatmul.mubr.bf16.vlgmr.msra.gmra.mrb[8].mxu0 %v333_v60  ;;  %944 = vmatprep.mubr.bf16.mxu1 %v333_v60  ;;  %v327_v1 = vmul.f32 %v1109_v0, %v323_v63 }
 0x110   :  { %555 = vmatprep.mubr.bf16.mxu0 %v1177_v39  ;;  %989 = vmatpush3.bf16.msra.mxu0 %v986_v8  ;;  %v698_v39 = vld [vmem:[%s1460_s6 + $0x10] sm:$0xff] }
 0x111   :  { %331 = vst [vmem:[#allocation3 + $0x10] sm:$0xff] %v327_v1  ;;  %v990_v10 = vpack.c.bf16 %v699_v9, %v698_v39  ;;  %v381_v9 = vrot.slane %v849_v31, %v62_v16 }
 0x112   :  { %v1111_v3 = vpop.eup %1110 }
 0x113   :  { %v328_v4 = vmul.f32 %v1111_v3, %v324_v2  ;;  %991 = vmatprep.subr.bf16.mxu0 %v990_v10 }
 0x114   :  { %993 = vmatpush3.bf16.msra.mxu0 %v990_v10 }
 0x115   :  { %332 = vst [vmem:[#allocation3 + $0x18] sm:$0xff] %v328_v4  ;;  %v334_v5 = vpack.c.bf16 %v328_v4, %v327_v1  ;;  %995 = vmatprep.subr.bf16.mxu0 %v994_v13 }
 0x117   :  { %556 = vmatmul.mubr.bf16.gmra.mrb[12].mxu0 %v334_v5  ;;  %945 = vmatmul.mubr.bf16.vlgmr.msra.gmra.mrb[4].mxu1 %v334_v5 }
 0x118   :  { %1026 = vmatpush3.bf16.msra.mxu1 %v986_v8  ;;  %997 = vmatpush3.bf16.msra.mxu0 %v994_v13 }
 0x119   :  { %1019 = vmatprep.subr.bf16.mxu1 %v990_v10  ;;  %999 = vmatprep.subr.bf16.mxu0 %v998_v17 }
 0x11c   :  { %1027 = vmatpush3.bf16.msra.mxu1 %v990_v10  ;;  %1001 = vmatpush3.bf16.msra.mxu0 %v998_v17  ;;  %v883_v10 = vld [vmem:[%s1459_s5 + $0x1] ss:$0 sm:$0xff]  ;;  %s1178_s5 = smov [#allocation3]  }
 0x11d   :  { %1020 = vmatprep.subr.bf16.mxu1 %v994_v13  ;;  %1003 = vmatprep.subr.bf16.mxu0 %v1002_v20  ;;  %s819_s17 = sshll.u32 %s1178_s5, 4  ;;  %s820_s17 = int_to_ptr.vmem [resolvable:$true] %s819_s17 }
 0x11e   :  { %s1152_s18 = scalar_lea.vmem %s820_s17, 1024  ;;  %p1157_p1 = scmp.lt.s32.totalorder %s820_s17, %s820_s17 }
 0x11f   :  { %p1153_p0 = scmp.ne.s32.totalorder %s820_s17, %s1152_s18  ;;  %p1158_p2 = scmp.lt.s32.totalorder %s1152_s18, %s1152_s18 }
 0x120   :  { %1028 = vmatpush3.bf16.msra.mxu1 %v994_v13  ;;  %1005 = vmatpush3.bf16.msra.mxu0 %v1002_v20 }
 0x121   :  { %1021 = vmatprep.subr.bf16.mxu1 %v998_v17  ;;  %1007 = vmatprep.subr.bf16.mxu0 %v1006_v23  ;;  %p1159_p3 = por %p1158_p2, %p1157_p1 }
 0x123   :  { %p1160_p4 = pnand %p1159_p3, %p1153_p0 }
 0x124   :  { %1029 = vmatpush3.bf16.msra.mxu1 %v998_v17  ;;  %1009 = vmatpush3.bf16.msra.mxu0 %v1006_v23 }
 0x125   :  { %1022 = vmatprep.subr.bf16.mxu1 %v1002_v20  ;;  %1011 = vmatprep.subr.bf16.mxu0 %v1010_v26 }
 0x128   :  { %1030 = vmatpush3.bf16.msra.mxu1 %v1002_v20  ;;  %1013 = vmatpush3.bf16.msra.mxu0 %v1010_v26 }
 0x129   :  { %1023 = vmatprep.subr.bf16.mxu1 %v1006_v23  ;;  %1015 = vmatprep.subr.bf16.mxu0 %v1014_v29 }
 0x12c   :  { %1031 = vmatpush3.bf16.msra.mxu1 %v1006_v23  ;;  %1017 = vmatpush3.bf16.msra.mxu0 %v1014_v29 }
 0x12d   :  { %1024 = vmatprep.subr.bf16.mxu1 %v1010_v26 }
 0x130   :  { %1032 = vmatpush3.bf16.msra.mxu1 %v1010_v26 }
 0x131   :  { %1025 = vmatprep.subr.bf16.mxu1 %v1014_v29 }
 0x134   :  { %1033 = vmatpush3.bf16.msra.mxu1 %v1014_v29 }
 0x1e2   :  { %v547_v33 = vpop.f32.mrb[8].mxu0 }
 0x1e3   :  { %v548_v35 = vadd.f32 %v547_v33, %v373_v32  ;;  %v549_v36 = vpop.f32.mrb[9].mxu0 }
 0x1e4   :  { %v551_v37 = vpop.f32.mrb[10].mxu0  ;;  %v550_v42 = vadd.f32 %v549_v36, %v377_v34 }
 0x1e5   :  { %v874_v38 = vmul.f32 -1.442695, %v548_v35  ;;  %v552_v40 = vadd.f32 %v551_v37, %v373_v32  ;;  %v553_v41 = vpop.f32.mrb[11].mxu0 }
 0x1e6   :  { %v554_v47 = vadd.f32 %v553_v41, %v377_v34  ;;  %v878_v48 = vmul.f32 -1.442695, %v550_v42 }
 0x1e7   :  { %1112 = vpow2.f32 %v874_v38  ;;  %v875_v45 = vmul.f32 -1.442695, %v552_v40 }
 0x1e8   :  { %v879_v53 = vmul.f32 -1.442695, %v554_v47 }
 0x1e9   :  { %1114 = vpow2.f32 %v875_v45 }
 0x1ea   :  { %v557_v49 = vpop.f32.mrb[12].mxu0  ;;  %v946_v50 = vpop.f32.mrb[4].mxu1  ;;  %1116 = vpow2.f32 %v878_v48 }
 0x1eb   :  { %v558_v51 = vadd.f32 %v557_v49, %v373_v32  ;;  %v559_v44 = vpop.f32.mrb[13].mxu0  ;;  %v600_v52 = vpop.f32.mrb[5].mxu1  ;;  %v609_v25 = vadd.f32 %v946_v50, %v381_v9 }
 0x1ec   :  { %v561_v54 = vpop.f32.mrb[14].mxu0  ;;  %v947_v46 = vpop.f32.mrb[6].mxu1  ;;  %v560_v56 = vadd.f32 %v559_v44, %v377_v34  ;;  %v601_v15 = vadd.f32 %v600_v52, %v381_v9 }
 0x1ed   :  { %v876_v55 = vmul.f32 -1.442695, %v558_v51  ;;  %v562_v57 = vadd.f32 %v561_v54, %v373_v32  ;;  %v563_v58 = vpop.f32.mrb[15].mxu0  ;;  %v603_v59 = vpop.f32.mrb[7].mxu1  ;;  %v612_v30 = vadd.f32 %v947_v46, %v381_v9 }
 0x1ee   :  { %v564_v62 = vadd.f32 %v563_v58, %v377_v34  ;;  %v880_v60 = vmul.f32 -1.442695, %v560_v56  ;;  %v604_v20 = vadd.f32 %v603_v59, %v381_v9 }
 0x1ef   :  { %1118 = vpow2.f32 %v876_v55  ;;  %v877_v61 = vmul.f32 -1.442695, %v562_v57 }
 0x1f0   :  { %1120 = vpow2.f32 %v879_v53  ;;  %v881_v3 = vmul.f32 -1.442695, %v564_v62 }
 0x1f1   :  { %v1113_v63 = vpop.eup %1112  ;;  %1122 = vpow2.f32 %v877_v61 }
 0x1f2   :  { %v627_v0 = vadd.f32 1.0, %v1113_v63 }
 0x1f3   :  { %v1115_v1 = vpop.eup %1114 }
 0x1f4   :  { %1124 = vrcp.f32 %v627_v0  ;;  %v628_v2 = vadd.f32 1.0, %v1115_v1  ;;  %v1117_v4 = vpop.eup %1116 }
 0x1f5   :  { %1126 = vpow2.f32 %v880_v60  ;;  %v651_v39 = vadd.f32 1.0, %v1117_v4 }
 0x1f6   :  { %1128 = vrcp.f32 %v628_v2 }
 0x1f7   :  { %1130 = vpow2.f32 %v881_v3 }
 0x1f9   :  { %v1119_v5 = vpop.eup %1118 }
 0x1fa   :  { %v1121_v6 = vpop.eup %1120  ;;  %v629_v7 = vadd.f32 1.0, %v1119_v5 }
 0x1fb   :  { %v1123_v8 = vpop.eup %1122  ;;  %v652_v12 = vadd.f32 1.0, %v1121_v6 }
 0x1fc   :  { %1132 = vrcp.f32 %v629_v7  ;;  %v630_v11 = vadd.f32 1.0, %v1123_v8 }
 0x1fe   :  { %v1125_v13 = vpop.eup %1124  ;;  %1134 = vrcp.f32 %v630_v11 }
 0x1ff   :  { %v1127_v14 = vpop.eup %1126  ;;  %1136 = vrcp.f32 %v651_v39  ;;  %v671_v17 = vmul.f32 %v1125_v13, %v883_v10 }
 0x200   :  { %v1129_v18 = vpop.eup %1128  ;;  %1138 = vrcp.f32 %v652_v12  ;;  %v653_v16 = vadd.f32 1.0, %v1127_v14 }
 0x201   :  { %v675_v19 = vadd.f32 %v671_v17, %v601_v15  ;;  %v672_v21 = vmul.f32 %v1129_v18, %v883_v10  ;;  %v1131_v43 = vpop.eup %1130 }
 0x202   :  { %v654_v23 = vadd.f32 1.0, %v1131_v43 }
 0x203   :  { %1140 = vtanh.f32 %v675_v19  ;;  %v676_v22 = vadd.f32 %v672_v21, %v604_v20 }
 0x205   :  { %1142 = vtanh.f32 %v676_v22 }
 0x206   :  { %v1133_v24 = vpop.eup %1132  ;;  %1144 = vrcp.f32 %v653_v16 }
 0x207   :  { %v673_v26 = vmul.f32 %v1133_v24, %v883_v10  ;;  %1146 = vrcp.f32 %v654_v23 }
 0x208   :  { %v1135_v27 = vpop.eup %1134 }
 0x209   :  { %v1137_v28 = vpop.eup %1136  ;;  %v677_v29 = vadd.f32 %v673_v26, %v609_v25  ;;  %v674_v31 = vmul.f32 %v1135_v27, %v883_v10 }
 0x20a   :  { %v1139_v32 = vpop.eup %1138  ;;  %v683_v34 = vsub.f32 1.0, %v1137_v28 }
 0x20b   :  { %1148 = vtanh.f32 %v677_v29  ;;  %v678_v33 = vadd.f32 %v674_v31, %v612_v30  ;;  %v684_v36 = vsub.f32 1.0, %v1139_v32 }
 0x20d   :  { %v1141_v35 = vpop.eup %1140  ;;  %1150 = vtanh.f32 %v678_v33 }
 0x20e   :  { %v687_v37 = vmul.f32 %v1141_v35, %v683_v34 }
 0x20f   :  { %v1143_v38 = vpop.eup %1142 }
 0x210   :  { %692 = vst [vmem:[#allocation3 + $0x20] sm:$0xff] %v687_v37  ;;  %980 = vmatprep.mubr.f32.mxu0 %v687_v37  ;;  %v688_v40 = vmul.f32 %v1143_v38, %v684_v36  ;;  %v1145_v41 = vpop.eup %1144 }
 0x211   :  { %v1147_v42 = vpop.eup %1146  ;;  %v685_v45 = vsub.f32 1.0, %v1145_v41 }
 0x212   :  { %693 = vst [vmem:[#allocation3 + $0x28] sm:$0xff] %v688_v40  ;;  %981 = vmatmul.mubr.f32.vlgmr.msra.gmra.mrb[16].mxu0 %v688_v40  ;;  %v686_v48 = vsub.f32 1.0, %v1147_v42 }
 0x215   :  { %v1149_v47 = vpop.eup %1148 }
 0x216   :  { %v689_v49 = vmul.f32 %v1149_v47, %v685_v45 }
 0x217   :  { %v1151_v50 = vpop.eup %1150 }
 0x218   :  { %694 = vst [vmem:[#allocation3 + $0x30] sm:$0xff] %v689_v49  ;;  %983 = vmatprep.mubr.f32.mxu1 %v689_v49  ;;  %v690_v51 = vmul.f32 %v1151_v50, %v686_v48 }
 0x21a   :  { %695 = vst [vmem:[#allocation3 + $0x38] sm:$0xff] %v690_v51  ;;  %984 = vmatmul.mubr.f32.vlgmr.msra.gmra.mrb[8].mxu1 %v690_v51 }
 0x21b   :  { %1163 = shalt.err (!%p1160_p4)
}
 0x21c   :  { %s1164_s20 = scalar_lea.hbm %s1463_s9, 1024 }
 0x21d   :  { %p1165_p5 = scmp.ne.s32.totalorder %s1463_s9, %s1164_s20  ;;  %p1168_p6 = scmp.lt.u32.totalorder %s1164_s20, %s1463_s9 }
 0x21f   :  { %p1170_p7 = pnand %p1168_p6, %p1165_p5 }
 0x221   :  { %1173 = shalt.err (!%p1170_p7)
}
 0x222   :  { %s1179_s25 = smov 128   ;;  %s1180_s26 = smov 8   ;;  %v720_v44 = vpop.permute.xlu0 %719  ;;  %vm807_vm1 = vcmask 31744  }
 0x223   :  { %825 = dma.vmem_to_hbm [thread:$0]  %s820_s17, 1024, %s1463_s9, [#allocation4], %s1179_s25, %s1179_s25, %s1180_s26  }
 0x2e5   :  { %v982_v52 = vpop.f32.mrb[16].mxu0 }
 0x2e6   :  { %v794_v53 = vadd.f32 %v982_v52, %v720_v44  ;;  %v788_v54 = vpop.f32.mrb[17].mxu0 }
 0x2e7   :  { %v789_v46 = vadd.f32 %v788_v54, %v720_v44 }
 0x2e8   :  { %809 = vst.msk [vmem:[%s1462_s8 + $0x8] sm:$0xff] %vm807_vm1, %v794_v53 }
 0x2e9   :  { %808 = vst.msk [vmem:[%s1462_s8] sm:$0xff] %vm807_vm1, %v789_v46 }
 0x2ed   :  { %v985_v55 = vpop.f32.mrb[8].mxu1 }
 0x2ee   :  { %v804_v56 = vadd.f32 %v985_v55, %v720_v44  ;;  %v798_v57 = vpop.f32.mrb[9].mxu1 }
 0x2ef   :  { %v799_v58 = vadd.f32 %v798_v57, %v720_v44 }
 0x2f0   :  { %811 = vst.msk [vmem:[%s1462_s8 + $0x18] sm:$0xff] %vm807_vm1, %v804_v56 }
 0x2f1   :  { %810 = vst.msk [vmem:[%s1462_s8 + $0x10] sm:$0xff] %vm807_vm1, %v799_v58 }
 0x2f2   :  { %1174 = dma.done.wait [#allocation4], 1024  }
 0x2f3   :  { %1175 = vsyncadd [#allocation4], 4294966272 }
 0x2f4   :  { %831 = vsyncpa [#allocation4], 1 }

</bundles_post_ra>
